<compile_context>
chip_gen: v6e
topology: v6e:2x2x1
jax: 0.10.0
libtpu: 0.0.40
codegen_flags: <defaults>
</compile_context>

<pallas_src>
import math

import jax
import jax.numpy as jnp
from jax import lax
from jax.experimental import pallas as pl
from jax.experimental.pallas import tpu as pltpu


def _round_up(x, m):
    return (x + m - 1) // m * m


def _cdiv(a, b):
    return -(-a // b)


# ---------------------------------------------------------------------------
# Pallas kernel: per-phase tiled matmul with bias.
#   xcol : (P, M_p, K_p)     bf16  per-phase tap-folded im2col
#   wmat : (P, K_p, Cout_p)  bf16  per-phase tap-folded (flipped) weights
#   bias : (1, Cout_p)       f32
#   out  : (P, M_p, Cout_p)  f32
# grid = (P, M tiles, K tiles); K (reduction) is innermost; the resident
# output block is the f32 accumulator, initialised with the bias at k == 0.
# ---------------------------------------------------------------------------
def _phase_matmul_kernel(x_ref, w_ref, b_ref, o_ref):
    @pl.when(pl.program_id(2) == 0)
    def _():
        o_ref[...] = jnp.broadcast_to(b_ref[...], o_ref.shape)

    o_ref[...] += jnp.dot(x_ref[...], w_ref[...],
                          preferred_element_type=jnp.float32)


def _pallas_phase_matmul(xcol, wmat, bias, *, tile_m, tile_k):
    P, M_p, K_p = xcol.shape
    Cout_p = wmat.shape[-1]
    assert M_p % tile_m == 0 and K_p % tile_k == 0
    grid = (P, M_p // tile_m, K_p // tile_k)
    return pl.pallas_call(
        _phase_matmul_kernel,
        out_shape=jax.ShapeDtypeStruct((P, M_p, Cout_p), jnp.float32),
        grid_spec=pltpu.PrefetchScalarGridSpec(
            num_scalar_prefetch=0,
            grid=grid,
            in_specs=[
                pl.BlockSpec((None, tile_m, tile_k), lambda p, i, k: (p, i, k)),
                # weight block index is independent of i: with one K tile the
                # phase's weights are fetched once and stay VMEM-resident
                # across every M tile of that phase.
                pl.BlockSpec((None, tile_k, Cout_p), lambda p, i, k: (p, k, 0)),
                pl.BlockSpec((1, Cout_p), lambda p, i, k: (0, 0)),
            ],
            out_specs=pl.BlockSpec((None, tile_m, Cout_p),
                                   lambda p, i, k: (p, i, 0)),
        ),
        compiler_params=pltpu.CompilerParams(
            dimension_semantics=("parallel", "parallel", "arbitrary")),
    )(xcol, wmat, bias)


class SamePadConvTranspose3d:
    """JAX/Pallas port of vq_gan_3d.model.vqgan.SamePadConvTranspose3d."""

    def __init__(self, in_channels, out_channels, kernel_size, stride=1,
                 bias=True, padding_type='replicate', *, key):
        if isinstance(kernel_size, int):
            kernel_size = (kernel_size,) * 3
        if isinstance(stride, int):
            stride = (stride,) * 3
        assert all(k >= s for k, s in zip(kernel_size, stride)), \
            "SamePadConvTranspose3d assumes kernel_size >= stride"
        self.in_channels = in_channels
        self.out_channels = out_channels
        self.kernel_size = tuple(kernel_size)
        self.stride = tuple(stride)

        total_pad = tuple(k - s for k, s in zip(kernel_size, stride))
        pad_input = []
        for p in total_pad[::-1]:                 # same ordering as the PyTorch module
            pad_input.append((p // 2 + p % 2, p // 2))
        self.pad_input = tuple(pad_input)         # ((wl, wr), (hl, hr), (dl, dr))
        self.padding_type = padding_type

        kd, kh, kw = self.kernel_size
        # nn.ConvTranspose3d weight layout: (in_channels, out_channels, kd, kh, kw)
        fan_in = out_channels * kd * kh * kw
        bound = 1.0 / math.sqrt(fan_in)
        wkey, bkey = jax.random.split(key)
        self.weight = jax.random.uniform(
            wkey, (in_channels, out_channels, kd, kh, kw),
            dtype=jnp.float32, minval=-bound, maxval=bound)
        if bias:
            self.bias = jax.random.uniform(
                bkey, (out_channels,), dtype=jnp.float32,
                minval=-bound, maxval=bound)
        else:
            self.bias = jnp.zeros((out_channels,), jnp.float32)

        # ---- static stride-phase / tap-folding metadata --------------------
        sd, sh, sw = self.stride
        self.taps = (_cdiv(kd, sd), _cdiv(kh, sh), _cdiv(kw, sw))   # J per dim
        self.phases = [(rd, rh, rw)
                       for rd in range(sd) for rh in range(sh) for rw in range(sw)]
        self.K = self.taps[0] * self.taps[1] * self.taps[2] * in_channels
        # per-phase tap-folded, spatially flipped weight matrices (P, K, Cout)
        self.wmat = self._build_phase_weights()

    def _build_phase_weights(self):
        kd, kh, kw = self.kernel_size
        sd, sh, sw = self.stride
        Jd, Jh, Jw = self.taps
        Cin, Cout = self.in_channels, self.out_channels
        # wf[ci, co, a, b, c] = weight[ci, co, kd-1-a, kh-1-b, kw-1-c]
        wf = jnp.flip(self.weight, axis=(2, 3, 4))
        zero = jnp.zeros((Cin, Cout), self.weight.dtype)
        mats = []
        for (rd, rh, rw) in self.phases:
            a0d, a0h, a0w = (sd - rd) % sd, (sh - rh) % sh, (sw - rw) % sw
            taps = []
            for jd in range(Jd):
                ad = a0d + jd * sd
                for jh in range(Jh):
                    bh = a0h + jh * sh
                    for jw in range(Jw):
                        cw = a0w + jw * sw
                        if ad < kd and bh < kh and cw < kw:
                            taps.append(wf[:, :, ad, bh, cw])       # (Cin, Cout)
                        else:
                            taps.append(zero)                       # padded tap
            mats.append(jnp.stack(taps, axis=0).reshape(Jd * Jh * Jw * Cin, Cout))
        return jnp.stack(mats, axis=0)                              # (P, K, Cout)

    def pad_replicate(self, x):
        (pwl, pwr), (phl, phr), (pdl, pdr) = self.pad_input
        mode = 'edge' if self.padding_type == 'replicate' else self.padding_type
        return jnp.pad(
            x, ((0, 0), (0, 0), (pdl, pdr), (phl, phr), (pwl, pwr)), mode=mode)

    def __call__(self, x):
        # x: (N, Cin, D, H, W)
        N, Cin, D, H, W = x.shape
        assert Cin == self.in_channels
        kd, kh, kw = self.kernel_size
        sd, sh, sw = self.stride
        Jd, Jh, Jw = self.taps
        Cout = self.out_channels

        # 1) replicate "same" pad, NCDHW -> NDHWC (layout glue)
        xc = jnp.transpose(self.pad_replicate(x), (0, 2, 3, 4, 1))
        _, Dp, Hp, Wp, _ = xc.shape

        # 2) output extents of ConvTranspose3d(stride=s, padding=k-1)
        Do = (Dp - 1) * sd - kd + 2
        Ho = (Hp - 1) * sh - kh + 2
        Wo = (Wp - 1) * sw - kw + 2
        Doq, Hoq, Woq = _cdiv(Do, sd), _cdiv(Ho, sh), _cdiv(Wo, sw)  # per-phase

        # 3) zero-extend so every (phase offset + tap) window stays in bounds
        ext = (max(0, Doq + Jd - Dp), max(0, Hoq + Jh - Hp), max(0, Woq + Jw - Wp))
        x_ext = jnp.pad(xc, ((0, 0), (0, ext[0]), (0, ext[1]), (0, ext[2]), (0, 0)))

        # 4) per-phase, tap-folded im2col: (P, M_q, K) with K = Jd*Jh*Jw*Cin
        M_q = N * Doq * Hoq * Woq
        cols = []
        for (rd, rh, rw) in self.phases:
            od = 0 if rd == 0 else 1
            oh = 0 if rh == 0 else 1
            ow = 0 if rw == 0 else 1
            taps = []
            for jd in range(Jd):
                for jh in range(Jh):
                    for jw in range(Jw):
                        taps.append(x_ext[:, od + jd: od + jd + Doq,
                                             oh + jh: oh + jh + Hoq,
                                             ow + jw: ow + jw + Woq, :])
            col = jnp.stack(taps, axis=4)            # (N, Doq, Hoq, Woq, J, Cin)
            cols.append(col.reshape(M_q, self.K))
        xcol = jnp.stack(cols, axis=0)               # (P, M_q, K)

        # 5) pad to MXU/lane-friendly shapes; bf16 operands, f32 accumulation
        K_p = _round_up(self.K, 128)
        tile_k = K_p if K_p <= 2048 else 2048
        K_p = _round_up(K_p, tile_k)
        Cout_p = _round_up(Cout, 128)
        tile_m = min(512, _round_up(M_q, 8))
        M_p = _round_up(M_q, tile_m)

        xcol = jnp.pad(xcol, ((0, 0), (0, M_p - M_q), (0, K_p - self.K)))
        xcol = xcol.astype(jnp.bfloat16)
        wmat = jnp.pad(self.wmat, ((0, 0), (0, K_p - self.K), (0, Cout_p - Cout)))
        wmat = wmat.astype(jnp.bfloat16)
        bias = jnp.pad(self.bias, (0, Cout_p - Cout)).reshape(1, Cout_p)

        # 6) Pallas hot path: per-phase MXU matmul, bias fused as accumulator init
        out = _pallas_phase_matmul(xcol, wmat, bias, tile_m=tile_m, tile_k=tile_k)

        # 7) drop padding, interleave the s^3 phases, NDHWC -> NCDHW
        out = out[:, :M_q, :Cout].reshape(sd, sh, sw, N, Doq, Hoq, Woq, Cout)
        out = jnp.transpose(out, (3, 4, 0, 5, 1, 6, 2, 7))
        out = out.reshape(N, Doq * sd, Hoq * sh, Woq * sw, Cout)[:, :Do, :Ho, :Wo, :]
        return jnp.transpose(out, (0, 4, 1, 2, 3)).astype(x.dtype)


def reference_forward(module, x):
    """Pure-JAX f32 reference: replicate pad + lax transposed conv."""
    x_pad = module.pad_replicate(x)
    # rhs[co, ci, a, b, c] = W[ci, co, K-1-a, K-1-b, K-1-c]
    rhs = jnp.transpose(jnp.flip(module.weight, axis=(2, 3, 4)), (1, 0, 2, 3, 4))
    out = lax.conv_general_dilated(
        x_pad, rhs, window_strides=(1, 1, 1),
        padding=[(0, 0), (0, 0), (0, 0)],      # explicit zeros: string 'VALID' is
        lhs_dilation=module.stride,            # rejected together with lhs_dilation
        dimension_numbers=('NCDHW', 'OIDHW', 'NCDHW'),
        precision=lax.Precision.HIGHEST)
    return out + module.bias.reshape(1, -1, 1, 1, 1)


if __name__ == "__main__":
    key = jax.random.PRNGKey(0)
    kx, kp = jax.random.split(key)

    N, Cin, Cout = 2, 4, 8
    D = H = W = 4
    mod = SamePadConvTranspose3d(Cin, Cout, kernel_size=4, stride=2,
                                 bias=True, padding_type='replicate', key=kp)

    x = jax.random.normal(kx, (N, Cin, D, H, W), dtype=jnp.float32)

    out = jax.block_until_ready(mod(x))

    ref = reference_forward(mod, x)
    assert out.shape == ref.shape == (N, Cout, 2 * D, 2 * H, 2 * W), (out.shape, ref.shape)
    # bf16 MXU operands with f32 accumulation -> tolerance set accordingly.
    max_err = float(jnp.max(jnp.abs(out - ref)))
    assert jnp.allclose(out, ref, atol=2e-2, rtol=2e-2), max_err

    print("KERNEL_OK")
</pallas_src>

<mosaic_0001>
module attributes {stable_mosaic.version = 11 : i64} {
  func.func @_phase_matmul_kernel(%arg0: i32, %arg1: i32, %arg2: i32, %arg3: memref<1x128x128xbf16, #tpu.memory_space<vmem>>, %arg4: memref<1x128x128xbf16, #tpu.memory_space<vmem>>, %arg5: memref<1x128xf32, #tpu.memory_space<vmem>>, %arg6: memref<1x128x128xf32, #tpu.memory_space<vmem>>) attributes {dimension_semantics = [#tpu.dimension_semantics<parallel>, #tpu.dimension_semantics<parallel>, #tpu.dimension_semantics<arbitrary>], iteration_bounds = array<i64: 8, 1, 1>, scalar_prefetch = 0 : i64, scratch_operands = 0 : i64, tpu.core_type = #tpu.core_type<tc>, window_params = [{transform_indices = @transform_0, window_bounds = array<i64: 1, 128, 128>}, {transform_indices = @transform_1, window_bounds = array<i64: 1, 128, 128>}, {pipeline_mode = #tpu.pipeline_mode<synchronous>, transform_indices = @transform_2, window_bounds = array<i64: 1, 128>}, {transform_indices = @transform_3, window_bounds = array<i64: 1, 128, 128>}]} {
    %c0_i32 = arith.constant 0 : i32
    %0 = arith.cmpi eq, %arg2, %c0_i32 : i32
    %1 = arith.extui %0 : i1 to i32
    %c0_i32_0 = arith.constant 0 : i32
    %2 = arith.cmpi ne, %1, %c0_i32_0 : i32
    scf.if %2 {
      %c0_12 = arith.constant 0 : index
      %c0_13 = arith.constant 0 : index
      %14 = vector.load %arg5[%c0_12, %c0_13] : memref<1x128xf32, #tpu.memory_space<vmem>>, vector<1x128xf32>
      %15 = vector.shape_cast %14 : vector<1x128xf32> to vector<1x128xf32>
      %16 = vector.broadcast %15 : vector<1x128xf32> to vector<128x128xf32>
      %c0_14 = arith.constant 0 : index
      %c0_15 = arith.constant 0 : index
      %c0_16 = arith.constant 0 : index
      %17 = vector.load %arg6[%c0_14, %c0_15, %c0_16] : memref<1x128x128xf32, #tpu.memory_space<vmem>>, vector<1x128x128xf32>
      %18 = vector.shape_cast %17 : vector<1x128x128xf32> to vector<128x128xf32>
      %19 = vector.shape_cast %16 : vector<128x128xf32> to vector<1x128x128xf32>
      tpu.vector_store %arg6[%c0_14, %c0_15, %c0_16], %19 {strides = array<i32>} : memref<1x128x128xf32, #tpu.memory_space<vmem>>, vector<1x128x128xf32>,
    } else {
    }
    %c0 = arith.constant 0 : index
    %c0_1 = arith.constant 0 : index
    %c0_2 = arith.constant 0 : index
    %3 = vector.load %arg6[%c0, %c0_1, %c0_2] : memref<1x128x128xf32, #tpu.memory_space<vmem>>, vector<1x128x128xf32>
    %4 = vector.shape_cast %3 : vector<1x128x128xf32> to vector<128x128xf32>
    %c0_3 = arith.constant 0 : index
    %c0_4 = arith.constant 0 : index
    %c0_5 = arith.constant 0 : index
    %5 = vector.load %arg3[%c0_3, %c0_4, %c0_5] : memref<1x128x128xbf16, #tpu.memory_space<vmem>>, vector<1x128x128xbf16>
    %6 = vector.shape_cast %5 : vector<1x128x128xbf16> to vector<128x128xbf16>
    %c0_6 = arith.constant 0 : index
    %c0_7 = arith.constant 0 : index
    %c0_8 = arith.constant 0 : index
    %7 = vector.load %arg4[%c0_6, %c0_7, %c0_8] : memref<1x128x128xbf16, #tpu.memory_space<vmem>>, vector<1x128x128xbf16>
    %8 = vector.shape_cast %7 : vector<1x128x128xbf16> to vector<128x128xbf16>
    %cst = arith.constant dense<0.000000e+00> : vector<128x128xf32>
    %9 = tpu.matmul %6, %8, %cst {dimension_numbers = #tpu.dot_dimension_numbers<[1], [0], [0], [1], [0, 0, 1, 1], [], []>} : vector<128x128xbf16>, vector<128x128xbf16>, vector<128x128xf32> -> vector<128x128xf32>
    %10 = arith.addf %4, %9 : vector<128x128xf32>
    %c0_9 = arith.constant 0 : index
    %c0_10 = arith.constant 0 : index
    %c0_11 = arith.constant 0 : index
    %11 = vector.load %arg6[%c0_9, %c0_10, %c0_11] : memref<1x128x128xf32, #tpu.memory_space<vmem>>, vector<1x128x128xf32>
    %12 = vector.shape_cast %11 : vector<1x128x128xf32> to vector<128x128xf32>
    %13 = vector.shape_cast %10 : vector<128x128xf32> to vector<1x128x128xf32>
    tpu.vector_store %arg6[%c0_9, %c0_10, %c0_11], %13 {strides = array<i32>} : memref<1x128x128xf32, #tpu.memory_space<vmem>>, vector<1x128x128xf32>,
    return
  }
  func.func @transform_0(%arg0: i32, %arg1: i32, %arg2: i32) -> (i32, i32, i32) {
    %c0_i32 = arith.constant 0 : i32
    return %arg0, %arg1, %arg2 : i32, i32, i32
  }
  func.func @transform_1(%arg0: i32, %arg1: i32, %arg2: i32) -> (i32, i32, i32) {
    %c0_i32 = arith.constant 0 : i32
    %c0_i32_0 = arith.constant 0 : i32
    return %arg0, %arg2, %c0_i32 : i32, i32, i32
  }
  func.func @transform_2(%arg0: i32, %arg1: i32, %arg2: i32) -> (i32, i32) {
    %c0_i32 = arith.constant 0 : i32
    %c0_i32_0 = arith.constant 0 : i32
    %c0_i32_1 = arith.constant 0 : i32
    return %c0_i32, %c0_i32_0 : i32, i32
  }
  func.func @transform_3(%arg0: i32, %arg1: i32, %arg2: i32) -> (i32, i32, i32) {
    %c0_i32 = arith.constant 0 : i32
    %c0_i32_0 = arith.constant 0 : i32
    return %arg0, %arg1, %c0_i32 : i32, i32, i32
  }
}

</mosaic_0001>

<bundles_post_ra>
// kernel: tpu_custom_call.1
= control target key start
LH: loop header
LB: loop body
LE: loop exit
PB: predicated region body
PF: predicated region fallthrough
CT: control target
= control target key end

     0   :  { %s1279_s0 = inlined_call_operand.hbm [shape: bf16[8,128,128], index: 0, kind: input, shape index: {}]   ;;  %s1280_s1 = inlined_call_operand.hbm [shape: bf16[8,128,128], index: 1, kind: input, shape index: {}]   ;;  %s1281_s2 = inlined_call_operand.vmem [shape: f32[1,128], index: 2, kind: input, shape index: {}]   ;;  %s1282_s3 = inlined_call_operand.hbm [shape: f32[8,128,128], index: 3, kind: output, shape index: {}]  }
   0x1   :  { %1283 = sst [smem:[#allocation11_spill]] %s1279_s0 }
   0x2   :  { %8 = vsyncpa [#allocation3], 0 }
   0x3   :  { %10 = vsyncpa [#allocation3 + $0x1], 0 }
   0x4   :  { %11 = vsyncpa [#allocation6], 0 }
   0x5   :  { %13 = vsyncpa [#allocation6 + $0x1], 0 }
   0x6   :  { %14 = vsyncpa [#allocation4], 0 }
   0x7   :  { %16 = vsyncpa [#allocation4 + $0x1], 0  ;;  %s1057_s12 = smov 0   ;;  %s1059_s13 = smov 0  }
   0x8   :  { %s1061_s14 = smov 0   ;;  %s1063_s15 = smov 0  }
   0x9   :  { %s1065_s16 = smov 0   ;;  %s1067_s17 = smov 0  }
   0xa LB: > { %s698_s18 = sadd.s32 4294967295, %s1028_s17   ;;  %s699_s19 = sadd.s32 4294967294, %s1028_s17   ;;  %s1028_s17 = sphi %s1067_s17, %s22_s17   ;;  %s1024_s16 = sphi %s1065_s16, %s1295_s16   ;;  %s1020_s15 = sphi %s1063_s15, %s1294_s15   ;;  %s1016_s14 = sphi %s1061_s14, %s1293_s14   ;;  %s1012_s13 = sphi %s1059_s13, %s1292_s13   ;;  %s1008_s12 = sphi %s1057_s12, %s1291_s12  }
   0xb   : > { %s41_s20 = sadd.s32 1, %s1024_s16  ;;  %s52_s21 = sadd.s32 1, %s1016_s14 }
   0xc   : > { %p43_p0 = scmp.ge.s32.totalorder %s41_s20, 8  ;;  %p59_p1 = scmp.ne.s32.totalorder %s1016_s14, %s1012_s13 }
   0xd   : > { %p60_p2 = scmp.eq.s32.totalorder %s1028_s17, 0  ;;  %p65_p3 = scmp.ne.s32.totalorder %s1012_s13, %s1008_s12 }
   0xe   : > { %s1297_s20 = smov (%p43_p0, %s41_s20), 0  ;;  %p66_p5 = scmp.eq.s32.totalorder %s698_s18, 0 }
   0xf   : > { %p1098_p4 = por %p60_p2, %p59_p1  ;;  %s45_s23 = ssub.s32 %s1024_s16, %s1297_s20 }
  0x10   : > { %p140_p6 = scmp.eq.s32.totalorder %s698_s18, 7  ;;  %p50_p7 = scmp.eq.s32.totalorder %s45_s23, 0 }
  0x11   : > { %p1104_p8 = por %p66_p5, %p65_p3  ;;  %p146_p10 = scmp.eq.s32.totalorder %s699_s19, 7 }
  0x12   : > { %p1108_p9 = por %p140_p6, %p59_p1  ;;  %p818_p12 = scmp.lt.s32.totalorder %s1028_s17, 8 }
  0x13   : > { %s1113_s26 = scalar_select %p50_p7, %s1016_s14, %s52_s21  }
  0x14   : > { %p1115_p11 = por %p146_p10, %p65_p3  ;;  %s1121_s28 = sand.u32 1, %s1016_s14  }
  0x15   : > { %s702_s29 = sshll.u32 %s1121_s28, 6  ;;  %s734_s30 = sshll.u32 %s1024_s16, 10 }
  0x16   : > { %s1288_s0 = sld [smem:[#allocation11_spill]]  ;;  %s173_s7 = scalar_lea.vmem [#allocation2], %s702_s29 }
  0x17   : > { %s183_s8 = sshll.u32 %s173_s7, 4  ;;  %p1134_p13 = pnand %p818_p12, %p1098_p4  ;;  %s184_s8 = int_to_ptr.vmem [resolvable:$true] %s183_s8 }
  0x18   : > { %p708_p0 = scmp.ge.s32.totalorder %s1028_s17, 1  ;;  %s170_s10 = scalar_lea.sflag [#allocation3], %s1121_s28 }
  0x19   : > { %p890_p1 = pneg %p1134_p13  ;;  %s901_s11 = scalar_lea.vmem %s184_s8, 1024 }
  0x1a   : > { %p902_p2 = scmp.ne.s32.totalorder %s184_s8, %s901_s11  ;;  %s1030_s18 = smov [#allocation2]  }
  0x1b   : > { %s906_s19 = sshll.u32 %s1030_s18, 4  ;;  %s907_s19 = int_to_ptr.vmem [resolvable:$false] %s906_s19 }
  0x1c   : > { %s182_s6 = scalar_lea.hbm %s1288_s0, %s734_s30  ;;  %p904_p3 = pnand %p902_p2, %p890_p1 }
  0x1d   : > { %s908_s21 = scalar_lea.vmem %s907_s19, 2048  ;;  %p909_p4 = scmp.lt.s32.totalorder %s184_s8, %s907_s19 }
  0x1e   : > { %p905_p5 = pneg %p904_p3  ;;  %p910_p6 = scmp.lt.s32.totalorder %s908_s21, %s901_s11 }
  0x20   : > { %p911_p7 = por %p910_p6, %p909_p4 }
  0x22   : > { %p912_p10 = pnand %p911_p7, %p905_p5 }
  0x24   : > { %915 = shalt.err (!%p912_p10)
}
  0x25   : > { %s1031_s22 = smov 64   ;;  %s1032_s23 = smov 4  }
  0x26   : > { %810 = dma.hbm_to_vmem [thread:$0]  (!%p1134_p13), %s182_s6, 1024, %s184_s8, %s170_s10, %s1031_s22, %s1031_s22, %s1032_s23  }
  0x27   : > { %p214_p12 = scmp.lt.s32.totalorder %s1028_s17, 9  ;;  %s205_s7 = scalar_lea.hbm %s1280_s1, %s734_s30 }
  0x28   : > { %s197_s18 = scalar_lea.vmem [#allocation5], %s702_s29  ;;  %s194_s21 = scalar_lea.sflag [#allocation6], %s1121_s28 }
  0x29   : > { %p1155_p2 = pnand %p708_p0, %p214_p12  ;;  %s206_s19 = sshll.u32 %s197_s18, 4  ;;  %s207_s19 = int_to_ptr.vmem [resolvable:$true] %s206_s19 }
  0x2a   : > { %s929_s0 = scalar_lea.vmem %s207_s19, 1024  ;;  %s1033_s6 = smov [#allocation5]  }
  0x2b   : > { %p930_p3 = scmp.ne.s32.totalorder %s207_s19, %s929_s0  ;;  %s934_s8 = sshll.u32 %s1033_s6, 4  ;;  %s935_s8 = int_to_ptr.vmem [resolvable:$false] %s934_s8 }
  0x2c   : > { %s936_s30 = scalar_lea.vmem %s935_s8, 2048  ;;  %p937_p6 = scmp.lt.s32.totalorder %s207_s19, %s935_s8 }
  0x2d   : > { %p932_p5 = pnand %p930_p3, %p890_p1  ;;  %p938_p0 = scmp.lt.s32.totalorder %s936_s30, %s929_s0 }
  0x2f   : > { %p933_p4 = pneg %p932_p5  ;;  %p939_p7 = por %p938_p0, %p937_p6 }
  0x31   : > { %p940_p10 = pnand %p939_p7, %p933_p4 }
  0x33   : > { %943 = shalt.err (!%p940_p10)
}
  0x34   : > { %813 = dma.hbm_to_vmem [thread:$0]  (!%p1134_p13), %s205_s7, 1024, %s207_s19, %s194_s21, %s1031_s22, %s1031_s22, %s1032_s23  }
  0x35   : > { %218 = sbr.rel (%p1155_p2) target bundleno = 317 (0x13d), region = 32  ;;  %s1170_s28 = sand.u32 (!%p1155_p2), 1, %s1012_s13  }
  0x36   : > { %s709_s29 = sshll.u32 (!%p1155_p2), %s1170_s28, 6  ;;  %s221_s10 = scalar_lea.sflag (!%p1155_p2), [#allocation3], %s1170_s28 }
  0x37   : > { %s1174_s4 = scalar_lea.vmem (!%p1155_p2), [#allocation2], %s709_s29 }
  0x3a   : > { %995 = dma.done.wait (%p1104_p8), %s221_s10, 1024  }
  0x3b   : > { %997 = vsyncadd (%p1104_p8), %s221_s10, 4294966272  ;;  %s230_s0 = scalar_lea.sflag [#allocation6], %s1170_s28  ;;  %s1181_s9 = scalar_lea.vmem [#allocation5], %s709_s29 }
  0x3c   : > { %999 = dma.done.wait (%p1104_p8), %s230_s0, 1024  }
  0x3d   : > { %1001 = vsyncadd (%p1104_p8), %s230_s0, 4294966272  ;;  %v872_v0 = vld [vmem:[%s1181_s9 + $0x38] sm:$0xff]   ;;  %v873_v1 = vld [vmem:[%s1181_s9 + $0x30] sm:$0xff]   ;;  %s711_s24 = sshll.u32 %s1170_s28, 7  ;;  %s736_s7 = sshll.u32 %s1020_s15, 11 }
  0x3e   : > { %753 = vmatprep.subr.bf16.mxu0 %v872_v0  ;;  %785 = vmatprep.subr.bf16.mxu1 %v872_v0  ;;  %v874_v2 = vld [vmem:[%s1181_s9 + $0x28] sm:$0xff]   ;;  %v875_v3 = vld [vmem:[%s1181_s9 + $0x20] sm:$0xff]   ;;  %v876_v6 = vld [vmem:[%s1181_s9 + $0x18] sm:$0xff]   ;;  %s1207_s5 = scalar_lea.vmem [#allocation7], %s711_s24  ;;  %s1226_s21 = scalar_lea.hbm %s1282_s3, %s736_s7 }
  0x3f   : > { %754 = vmatpush3.bf16.msra.mxu0 %v872_v0  ;;  %793 = vmatpush3.bf16.msra.mxu1 %v872_v0  ;;  %v880_v4 = vld [vmem:[%s1174_s4] sm:$0xff]   ;;  %v877_v7 = vld [vmem:[%s1181_s9 + $0x10] sm:$0xff]   ;;  %v878_v8 = vld [vmem:[%s1181_s9 + $0x8] sm:$0xff]   ;;  %s581_s11 = sshll.u32 %s1207_s5, 4  ;;  %s566_s15 = scalar_lea.sflag [#allocation4], %s1170_s28  ;;  %s1228_s11 = int_to_ptr.vmem [resolvable:$true] %s581_s11 }
  0x40   : > { %755 = vmatprep.subr.bf16.mxu0 %v873_v1  ;;  %786 = vmatprep.subr.bf16.mxu1 %v873_v1  ;;  %v881_v5 = vld [vmem:[%s1174_s4 + $0x20] sm:$0xff]   ;;  %v882_v10 = vld [vmem:[%s1174_s4 + $0x8] sm:$0xff]   ;;  %v884_v12 = vld [vmem:[%s1174_s4 + $0x10] sm:$0xff]   ;;  %s944_s6 = scalar_lea.vmem %s1228_s11, 2048  ;;  %s1034_s8 = smov [#allocation7]  }
  0x41   : > { %769 = vmatprep.mubr.bf16.mxu0 %v880_v4  ;;  %777 = vmatprep.mubr.bf16.mxu1 %v881_v5  ;;  %v879_v9 = vld [vmem:[%s1181_s9] sm:$0xff]   ;;  %v883_v11 = vld [vmem:[%s1174_s4 + $0x28] sm:$0xff]   ;;  %v885_v13 = vld [vmem:[%s1174_s4 + $0x30] sm:$0xff]   ;;  %p945_p8 = scmp.ne.s32.totalorder %s1228_s11, %s944_s6  ;;  %s948_s30 = sshll.u32 %s1034_s8, 4  ;;  %s949_s30 = int_to_ptr.vmem [resolvable:$false] %s948_s30 }
  0x42   : > { %v886_v14 = vld [vmem:[%s1174_s4 + $0x18] sm:$0xff]   ;;  %v712_v16 = vld [vmem:[%s1281_s2] ss:$0 sm:$0xff]  ;;  %s950_s29 = scalar_lea.vmem %s949_s30, 4096  ;;  %p951_p12 = scmp.lt.s32.totalorder %s1228_s11, %s949_s30 }
  0x43   : > { %756 = vmatpush3.bf16.msra.mxu0 %v873_v1  ;;  %794 = vmatpush3.bf16.msra.mxu1 %v873_v1  ;;  %v887_v15 = vld [vmem:[%s1174_s4 + $0x38] sm:$0xff]   ;;  %p946_p13 = pnand %p945_p8, %p1108_p9  ;;  %p952_p2 = scmp.lt.s32.totalorder %s950_s29, %s944_s6 }
  0x44   : > { %757 = vmatprep.subr.bf16.mxu0 %v874_v2  ;;  %787 = vmatprep.subr.bf16.mxu1 %v874_v2 }
  0x45   : > { %p947_p1 = pneg %p946_p13  ;;  %p953_p3 = por %p952_p2, %p951_p12 }
  0x47   : > { %758 = vmatpush3.bf16.msra.mxu0 %v874_v2  ;;  %795 = vmatpush3.bf16.msra.mxu1 %v874_v2  ;;  %p954_p5 = pnand %p953_p3, %p947_p1 }
  0x48   : > { %759 = vmatprep.subr.bf16.mxu0 %v875_v3  ;;  %788 = vmatprep.subr.bf16.mxu1 %v875_v3 }
  0x4b   : > { %760 = vmatpush3.bf16.msra.mxu0 %v875_v3  ;;  %796 = vmatpush3.bf16.msra.mxu1 %v875_v3 }
  0x4c   : > { %761 = vmatprep.subr.bf16.mxu0 %v876_v6  ;;  %789 = vmatprep.subr.bf16.mxu1 %v876_v6 }
  0x4f   : > { %762 = vmatpush3.bf16.msra.mxu0 %v876_v6  ;;  %797 = vmatpush3.bf16.msra.mxu1 %v876_v6 }
  0x50   : > { %763 = vmatprep.subr.bf16.mxu0 %v877_v7  ;;  %790 = vmatprep.subr.bf16.mxu1 %v877_v7 }
  0x53   : > { %764 = vmatpush3.bf16.msra.mxu0 %v877_v7  ;;  %798 = vmatpush3.bf16.msra.mxu1 %v877_v7 }
  0x54   : > { %765 = vmatprep.subr.bf16.mxu0 %v878_v8  ;;  %791 = vmatprep.subr.bf16.mxu1 %v878_v8 }
  0x57   : > { %766 = vmatpush3.bf16.msra.mxu0 %v878_v8  ;;  %799 = vmatpush3.bf16.msra.mxu1 %v878_v8 }
  0x58   : > { %767 = vmatprep.subr.bf16.mxu0 %v879_v9  ;;  %792 = vmatprep.subr.bf16.mxu1 %v879_v9 }
  0x5b   : > { %768 = vmatpush3.bf16.msra.mxu0 %v879_v9  ;;  %800 = vmatpush3.bf16.msra.mxu1 %v879_v9 }
  0x5e   : > { %770 = vmatmul.mubr.bf16.vlgmr.msra.gmra.mxu0 %v882_v10  ;;  %778 = vmatmul.mubr.bf16.vlgmr.msra.gmra.mxu1 %v883_v11 }
  0x5f   : > { %773 = vmatprep.mubr.bf16.mxu0 %v884_v12  ;;  %781 = vmatprep.mubr.bf16.mxu1 %v885_v13 }
  0x66   : > { %774 = vmatmul.mubr.bf16.gmra.mxu0 %v886_v14  ;;  %782 = vmatmul.mubr.bf16.gmra.mxu1 %v887_v15 }
 0x11e   : > { %v771_v17 = vpop.f32.mrf.mxu0  ;;  %v779_v18 = vpop.f32.mrf.mxu1 }
 0x11f   : > { %v535_v19 = vadd.f32 %v771_v17, %v712_v16  ;;  %v543_v20 = vadd.f32 %v779_v18, %v712_v16 }
 0x120   : > { %v470_v21 = vpop.f32.mrf.mxu0  ;;  %v502_v22 = vpop.f32.mrf.mxu1 }
 0x121   : > { %551 = vst [vmem:[%s1207_s5 + $0x10] sm:$0xff] %v535_v19  ;;  %559 = vst [vmem:[%s1207_s5 + $0x50] sm:$0xff] %v543_v20  ;;  %v533_v23 = vadd.f32 %v712_v16, %v470_v21  ;;  %v541_v24 = vadd.f32 %v712_v16, %v502_v22 }
 0x122   : > { %v772_v25 = vpop.f32.mrf.mxu0  ;;  %v780_v26 = vpop.f32.mrf.mxu1 }
 0x123   : > { %549 = vst [vmem:[%s1207_s5] sm:$0xff] %v533_v23  ;;  %557 = vst [vmem:[%s1207_s5 + $0x40] sm:$0xff] %v541_v24  ;;  %v536_v27 = vadd.f32 %v772_v25, %v712_v16  ;;  %v544_v28 = vadd.f32 %v780_v26, %v712_v16 }
 0x124   : > { %v473_v29 = vpop.f32.mrf.mxu0  ;;  %v505_v30 = vpop.f32.mrf.mxu1 }
 0x125   : > { %552 = vst [vmem:[%s1207_s5 + $0x18] sm:$0xff] %v536_v27  ;;  %560 = vst [vmem:[%s1207_s5 + $0x58] sm:$0xff] %v544_v28  ;;  %v534_v31 = vadd.f32 %v712_v16, %v473_v29  ;;  %v542_v32 = vadd.f32 %v712_v16, %v505_v30 }
 0x126   : > { %v775_v33 = vpop.f32.mrf.mxu0  ;;  %v783_v34 = vpop.f32.mrf.mxu1 }
 0x127   : > { %550 = vst [vmem:[%s1207_s5 + $0x8] sm:$0xff] %v534_v31  ;;  %558 = vst [vmem:[%s1207_s5 + $0x48] sm:$0xff] %v542_v32  ;;  %v539_v35 = vadd.f32 %v775_v33, %v712_v16  ;;  %v547_v36 = vadd.f32 %v783_v34, %v712_v16 }
 0x128   : > { %v486_v37 = vpop.f32.mrf.mxu0  ;;  %v518_v38 = vpop.f32.mrf.mxu1 }
 0x129   : > { %555 = vst [vmem:[%s1207_s5 + $0x30] sm:$0xff] %v539_v35  ;;  %563 = vst [vmem:[%s1207_s5 + $0x70] sm:$0xff] %v547_v36  ;;  %v537_v39 = vadd.f32 %v712_v16, %v486_v37  ;;  %v545_v40 = vadd.f32 %v712_v16, %v518_v38 }
 0x12a   : > { %v776_v41 = vpop.f32.mrf.mxu0  ;;  %v784_v42 = vpop.f32.mrf.mxu1 }
 0x12b   : > { %553 = vst [vmem:[%s1207_s5 + $0x20] sm:$0xff] %v537_v39  ;;  %561 = vst [vmem:[%s1207_s5 + $0x60] sm:$0xff] %v545_v40  ;;  %v540_v43 = vadd.f32 %v776_v41, %v712_v16  ;;  %v548_v44 = vadd.f32 %v784_v42, %v712_v16 }
 0x12c   : > { %v489_v45 = vpop.f32.mrf.mxu0  ;;  %v521_v46 = vpop.f32.mrf.mxu1 }
 0x12d   : > { %556 = vst [vmem:[%s1207_s5 + $0x38] sm:$0xff] %v540_v43  ;;  %564 = vst [vmem:[%s1207_s5 + $0x78] sm:$0xff] %v548_v44  ;;  %v538_v47 = vadd.f32 %v712_v16, %v489_v45  ;;  %v546_v48 = vadd.f32 %v712_v16, %v521_v46 }
 0x12f   : > { %554 = vst [vmem:[%s1207_s5 + $0x28] sm:$0xff] %v538_v47  ;;  %562 = vst [vmem:[%s1207_s5 + $0x68] sm:$0xff] %v546_v48 }
 0x130   : > { %957 = shalt.err (!%p954_p5)
}
 0x131   : > { %s958_s10 = scalar_lea.hbm %s1226_s21, 2048  ;;  %s962_s9 = scalar_lea.hbm %s1282_s3, 16384 }
 0x132   : > { %p959_p4 = scmp.ne.s32.totalorder %s1226_s21, %s958_s10  ;;  %p963_p7 = scmp.lt.s32.totalorder %s1226_s21, %s1282_s3 }
 0x133   : > { %p964_p10 = scmp.lt.s32.totalorder %s962_s9, %s958_s10 }
 0x134   : > { %p960_p6 = pnand %p959_p4, %p1108_p9 }
 0x135   : > { %p965_p8 = por %p964_p10, %p963_p7 }
 0x136   : > { %p961_p0 = pneg %p960_p6 }
 0x138   : > { %p966_p13 = pnand %p965_p8, %p961_p0 }
 0x13a   : > { %969 = shalt.err (!%p966_p13)
}
 0x13b   : > { %s1035_s23 = smov 128   ;;  %s1036_s5 = smov 8  }
 0x13c   : > { %805 = dma.vmem_to_hbm [thread:$0]  (%p1108_p9), %s1228_s11, 2048, %s1226_s21, %s566_s15, %s1035_s23, %s1035_s23, %s1036_s5  }
 0x13d PF: > { %p819_p1 = scmp.ge.s32.totalorder %s1028_s17, 2  ;;  %s596_s7 = sand.u32 1, %s1008_s12  }
 0x13e   : > { %s597_s18 = scalar_lea.sflag [#allocation4], %s596_s7 }
 0x13f   : > { %p815_p12 = pnand %p819_p1, %p1115_p11 }
 0x141   : > { %p816_p2 = pneg %p815_p12 }
 0x143   : > { %1003 = dma.done.wait (%p816_p2), %s597_s18, 2048  }
 0x144   : > { %1005 = vsyncadd (%p816_p2), %s597_s18, 4294965248  ;;  %s22_s17 = sadd.s32 1, %s1028_s17   ;;  %s1291_s12 = smov %s1012_s13 }
 0x145   : > { %p19_p3 = scmp.ge.s32.totalorder %s22_s17, 10   ;;  %s1292_s13 = smov %s1016_s14 }
 0x146   : > { %s1293_s14 = smov %s1113_s26  ;;  %s1294_s15 = smov %s1024_s16 }
 0x147   : > { %s1295_s16 = smov %s1297_s20  ;;  %21 = sbr.rel (!%p19_p3) target bundleno = 10 (0xa), region = 94 }
 0x14c   :  { %602 = vsyncpa [#allocation3], 1 }
 0x14d   :  { %604 = vsyncpa [#allocation3 + $0x1], 1 }
 0x14e   :  { %605 = vsyncpa [#allocation6], 1 }
 0x14f   :  { %607 = vsyncpa [#allocation6 + $0x1], 1 }
 0x150   :  { %608 = vsyncpa [#allocation4], 1 }
 0x151   :  { %610 = vsyncpa [#allocation4 + $0x1], 1 }

</bundles_post_ra>
